<compile_context>
chip_gen: v5e
topology: v5e:2x2
jax: 0.10.0
libtpu: 0.0.40
codegen_flags: <defaults>
</compile_context>

<pallas_src>
import jax
import jax.numpy as jnp
from jax.experimental import pallas as pl
from jax.experimental.pallas import tpu as pltpu

POOL = 7  # torch.nn.AvgPool2d(kernel_size=7, stride=1, padding=0)


def _head_kernel(x_ref, w_ref, b_ref, out_ref):
    """Fused AvgPool2d(7,1,0) + Linear(C->C) for one batch tile of one view.

    x_ref  : (tB, H, W, C) bf16 NHWC feature-map tile
    w_ref  : (C, C)        bf16, = W^T * (1/49) (pool scale folded in), resident
    b_ref  : (1, C)        f32 bias
    out_ref: (tB, C) if S == 1 else (tB, S, C), f32; S = (H-6)*(W-6)
    """
    tB, H, W, C = x_ref.shape
    HO, WO = H - POOL + 1, W - POOL + 1

    if HO == 1 and WO == 1:
        # Real densenet201 case (H = W = 7): the pool collapses to a full
        # spatial sum.  Accumulate in f32 one H-slab at a time so only a
        # (tB, W, C) slab + a (tB, C) accumulator are live (no full-tile f32
        # materialization / spills at large tB).
        pooled = jnp.zeros((tB, C), jnp.float32)
        for h in range(H):
            slab = x_ref[:, pl.ds(h, 1), :, :].astype(jnp.float32)  # (tB,1,W,C)
            pooled = pooled + jnp.sum(slab, axis=(1, 2))             # (tB, C)
    else:
        # Separable 7x7 stride-1 pool: 6 adds along W then 6 adds along H.
        # TODO(synk): at large H,W the sublane-shifted slices relayout; use
        # pltpu.roll if this path ever becomes hot (real densenet skips it).
        x = x_ref[...].astype(jnp.float32)
        row = x[:, :, 0:WO, :]
        for dw in range(1, POOL):
            row = row + x[:, :, dw:dw + WO, :]                       # (tB,H,WO,C)
        acc = row[:, 0:HO, :, :]
        for dh in range(1, POOL):
            acc = acc + row[:, dh:dh + HO, :, :]                     # (tB,HO,WO,C)
        pooled = acc.reshape(tB * HO * WO, C)

    # Linear on the MXU: bf16 operands, f32 accumulation; bias added in f32.
    y = jnp.dot(pooled.astype(jnp.bfloat16), w_ref[...],
                preferred_element_type=jnp.float32)
    y = y + b_ref[...]                                               # (1,C) bcast
    out_ref[...] = y.reshape(out_ref.shape).astype(out_ref.dtype)


def _round_up(x, m):
    return -(-x // m) * m


def _padded_vmem_bytes(shape, dtype):
    """Approx VMEM bytes of one buffer of `shape` after (sublane, 128) tiling."""
    itemsize = jnp.dtype(dtype).itemsize
    sublane = 8 * max(1, 4 // itemsize)        # f32: 8, bf16: 16
    if len(shape) == 1:
        return _round_up(shape[0], 128) * itemsize * 8
    lead = 1
    for d in shape[:-2]:
        lead *= d
    return (lead * _round_up(shape[-2], sublane)
            * _round_up(shape[-1], 128) * itemsize)


def _vmem_limit_bytes():
    """Generation-aware scoped-VMEM limit: ~96 MiB on v5e/v6e (128 MiB phys),
    ~48 MiB on v7x (64 MiB phys); conservative fallback if the query fails."""
    cap = None
    try:
        cap = getattr(pltpu.get_tpu_info(), "vmem_capacity_bytes", None)
    except Exception:
        cap = None
    if not cap:
        cap = 64 << 20
    return min(int(cap) * 3 // 4, 100 << 20)


def _pick_block_b(B, per_sample_bytes, budget_bytes):
    """Largest divisor of B whose double-buffered (in+out) block fits the budget.
    Prefer >=2 grid steps with an 8-aligned tile (megacore split on v7x and
    unmasked output sublane stores); otherwise take the largest fitting tile."""
    fitting = [d for d in range(1, B + 1)
               if B % d == 0 and d * per_sample_bytes <= budget_bytes]
    assert fitting, (
        f"single-sample block ({per_sample_bytes} B) exceeds the VMEM budget "
        f"({budget_bytes} B); shrink H/W/C or raise the limit")
    aligned_multi = [d for d in fitting if d % 8 == 0 and B // d >= 2]
    return max(aligned_multi) if aligned_multi else max(fitting)


def _visual_head(x_nhwc, w_t_scaled, bias):
    """One view's head. x_nhwc: (B,H,W,C) bf16; w_t_scaled: (C,C) bf16 = W^T/49;
    bias: (1,C) f32.  Returns f32 (B, S, C), matching
    avg.view(B, C, -1).transpose(1, 2) @ W^T + b."""
    B, H, W, C = x_nhwc.shape
    HO, WO = H - POOL + 1, W - POOL + 1
    assert HO >= 1 and WO >= 1, "feature map smaller than the 7x7 pool window"
    S = HO * WO

    vmem_limit = _vmem_limit_bytes()
    # TODO(synk): pl.Buffered(1) on the weight spec would reclaim its redundant
    # second buffer (its block index never changes); budget for 2x instead.
    w_bytes = 2 * _padded_vmem_bytes((C, C), w_t_scaled.dtype)
    out_block = (1, C) if S == 1 else (1, S, C)
    per_sample = 2 * (_padded_vmem_bytes((1, H, W, C), x_nhwc.dtype)
                      + _padded_vmem_bytes(out_block, jnp.float32))
    budget = vmem_limit - w_bytes - (2 << 20)          # 2 MiB slack (bias, temps)
    tB = _pick_block_b(B, per_sample, budget)

    if S == 1:
        # Dense (tB, C) output block -> full sublane stores; wrapper reshapes
        # back to (B, 1, C).
        out_shape = jax.ShapeDtypeStruct((B, C), jnp.float32)
        out_spec = pl.BlockSpec((tB, C), lambda i: (i, 0))
    else:
        out_shape = jax.ShapeDtypeStruct((B, S, C), jnp.float32)
        out_spec = pl.BlockSpec((tB, S, C), lambda i: (i, 0, 0))

    out = pl.pallas_call(
        _head_kernel,
        grid=(B // tB,),
        in_specs=[
            pl.BlockSpec((tB, H, W, C), lambda i: (i, 0, 0, 0)),
            pl.BlockSpec((C, C), lambda i: (0, 0)),    # resident across the grid
            pl.BlockSpec((1, C), lambda i: (0, 0)),
        ],
        out_specs=out_spec,
        out_shape=out_shape,
        compiler_params=pltpu.CompilerParams(
            dimension_semantics=("parallel",),         # batch tiles shard on v7x
            vmem_limit_bytes=vmem_limit,
        ),
    )(x_nhwc, w_t_scaled, bias)

    return out.reshape(B, 1, C) if S == 1 else out


@jax.jit
def visual_feature_extractor_forward(frontal_feats, lateral_feats, params):
    """Mirrors VisualFeatureExtractor.forward given backbone feature maps (NCHW):
    returns (visual_features_frontal, visual_features_lateral,
             avg_features_frontal, avg_features_lateral)."""
    # TODO(synk): if the backbone emitted bf16 NHWC directly, the single
    # transpose+cast pass below would disappear as well.
    inv = jnp.float32(1.0 / (POOL * POOL))
    avg_out = []
    for feats, wk, bk in ((frontal_feats, "w_frontal", "b_frontal"),
                          (lateral_feats, "w_lateral", "b_lateral")):
        # One fused pass: read f32 NCHW, write bf16 NHWC (halves kernel DMA
        # bytes).  No jnp.stack -> no extra materialized HBM copy.
        x_nhwc = jnp.transpose(feats, (0, 2, 3, 1)).astype(jnp.bfloat16)
        w = (params[wk].T * inv).astype(jnp.bfloat16)   # fold 1/49 into W^T
        b = params[bk].astype(jnp.float32)[None, :]     # (1, C)
        avg_out.append(_visual_head(x_nhwc, w, b))
    return frontal_feats, lateral_feats, avg_out[0], avg_out[1]


if __name__ == "__main__":
    key = jax.random.PRNGKey(0)
    kf, kl, kwf, kbf, kwl, kbl, kf7, kl7 = jax.random.split(key, 8)

    # Small synthetic shapes (lane-aligned C=128). Real densenet201: C=1920, H=W=7.
    B, C = 2, 128
    bound = 1.0 / (C ** 0.5)
    params = {
        "w_frontal": jax.random.uniform(kwf, (C, C), jnp.float32, -bound, bound),
        "b_frontal": jax.random.uniform(kbf, (C,), jnp.float32, -bound, bound),
        "w_lateral": jax.random.uniform(kwl, (C, C), jnp.float32, -bound, bound),
        "b_lateral": jax.random.uniform(kbl, (C,), jnp.float32, -bound, bound),
    }

    # Pure-JAX reference for the head (f32 end to end).
    def ref_head(feat, w, b):
        pooled = jax.lax.reduce_window(
            feat, 0.0, jax.lax.add,
            window_dimensions=(1, 1, POOL, POOL),
            window_strides=(1, 1, 1, 1),
            padding="VALID") / float(POOL * POOL)
        Bb, Cc = pooled.shape[0], pooled.shape[1]
        flat = pooled.reshape(Bb, Cc, -1).transpose(0, 2, 1)      # (B, S, C)
        return flat @ w.T + b

    # Exercise both pooling paths: H=W=8 (separable) and H=W=7 (full spatial sum).
    for (H, W), (ka, kb) in (((8, 8), (kf, kl)), ((7, 7), (kf7, kl7))):
        frontal = jax.random.normal(ka, (B, C, H, W), jnp.float32)
        lateral = jax.random.normal(kb, (B, C, H, W), jnp.float32)

        outs = visual_feature_extractor_forward(frontal, lateral, params)
        jax.block_until_ready(outs)

        ref_f = ref_head(frontal, params["w_frontal"], params["b_frontal"])
        ref_l = ref_head(lateral, params["w_lateral"], params["b_lateral"])
        # bf16 feature maps + bf16 MXU operands with f32 accumulation
        # -> relaxed tolerance vs the f32 reference.
        assert jnp.allclose(outs[2], ref_f, atol=2e-2, rtol=2e-2), (H, W)
        assert jnp.allclose(outs[3], ref_l, atol=2e-2, rtol=2e-2), (H, W)
        assert jnp.array_equal(outs[0], frontal) and jnp.array_equal(outs[1], lateral)

    print("KERNEL_OK")
</pallas_src>

<mosaic_0001>
module attributes {stable_mosaic.version = 11 : i64} {
  func.func @_head_kernel(%arg0: i32, %arg1: memref<2x8x8x128xbf16, #tpu.memory_space<vmem>>, %arg2: memref<128x128xbf16, #tpu.memory_space<vmem>>, %arg3: memref<1x128xf32, #tpu.memory_space<vmem>>, %arg4: memref<2x4x128xf32, #tpu.memory_space<vmem>>) attributes {dimension_semantics = [#tpu.dimension_semantics<parallel>], iteration_bounds = array<i64: 1>, scalar_prefetch = 0 : i64, scratch_operands = 0 : i64, tpu.core_type = #tpu.core_type<tc>, window_params = [{transform_indices = @transform_0, window_bounds = array<i64: 2, 8, 8, 128>}, {pipeline_mode = #tpu.pipeline_mode<synchronous>, transform_indices = @transform_1, window_bounds = array<i64: 128, 128>}, {pipeline_mode = #tpu.pipeline_mode<synchronous>, transform_indices = @transform_2, window_bounds = array<i64: 1, 128>}, {transform_indices = @transform_3, window_bounds = array<i64: 2, 4, 128>}]} {
    %c0 = arith.constant 0 : index
    %c0_0 = arith.constant 0 : index
    %c0_1 = arith.constant 0 : index
    %c0_2 = arith.constant 0 : index
    %0 = vector.load %arg1[%c0, %c0_0, %c0_1, %c0_2] : memref<2x8x8x128xbf16, #tpu.memory_space<vmem>>, vector<2x8x8x128xbf16>
    %1 = arith.extf %0 : vector<2x8x8x128xbf16> to vector<2x8x8x128xf32>
    %2 = vector.extract_strided_slice %1 {offsets = [0, 0, 0, 0], sizes = [2, 8, 2, 128], strides = [1, 1, 1, 1]} : vector<2x8x8x128xf32> to vector<2x8x2x128xf32>
    %3 = vector.extract_strided_slice %1 {offsets = [0, 0, 1, 0], sizes = [2, 8, 2, 128], strides = [1, 1, 1, 1]} : vector<2x8x8x128xf32> to vector<2x8x2x128xf32>
    %4 = arith.addf %2, %3 : vector<2x8x2x128xf32>
    %5 = vector.extract_strided_slice %1 {offsets = [0, 0, 2, 0], sizes = [2, 8, 2, 128], strides = [1, 1, 1, 1]} : vector<2x8x8x128xf32> to vector<2x8x2x128xf32>
    %6 = arith.addf %4, %5 : vector<2x8x2x128xf32>
    %7 = vector.extract_strided_slice %1 {offsets = [0, 0, 3, 0], sizes = [2, 8, 2, 128], strides = [1, 1, 1, 1]} : vector<2x8x8x128xf32> to vector<2x8x2x128xf32>
    %8 = arith.addf %6, %7 : vector<2x8x2x128xf32>
    %9 = vector.extract_strided_slice %1 {offsets = [0, 0, 4, 0], sizes = [2, 8, 2, 128], strides = [1, 1, 1, 1]} : vector<2x8x8x128xf32> to vector<2x8x2x128xf32>
    %10 = arith.addf %8, %9 : vector<2x8x2x128xf32>
    %11 = vector.extract_strided_slice %1 {offsets = [0, 0, 5, 0], sizes = [2, 8, 2, 128], strides = [1, 1, 1, 1]} : vector<2x8x8x128xf32> to vector<2x8x2x128xf32>
    %12 = arith.addf %10, %11 : vector<2x8x2x128xf32>
    %13 = vector.extract_strided_slice %1 {offsets = [0, 0, 6, 0], sizes = [2, 8, 2, 128], strides = [1, 1, 1, 1]} : vector<2x8x8x128xf32> to vector<2x8x2x128xf32>
    %14 = arith.addf %12, %13 : vector<2x8x2x128xf32>
    %15 = vector.extract_strided_slice %14 {offsets = [0, 0, 0, 0], sizes = [2, 2, 2, 128], strides = [1, 1, 1, 1]} : vector<2x8x2x128xf32> to vector<2x2x2x128xf32>
    %16 = vector.extract_strided_slice %14 {offsets = [0, 1, 0, 0], sizes = [2, 2, 2, 128], strides = [1, 1, 1, 1]} : vector<2x8x2x128xf32> to vector<2x2x2x128xf32>
    %17 = arith.addf %15, %16 : vector<2x2x2x128xf32>
    %18 = vector.extract_strided_slice %14 {offsets = [0, 2, 0, 0], sizes = [2, 2, 2, 128], strides = [1, 1, 1, 1]} : vector<2x8x2x128xf32> to vector<2x2x2x128xf32>
    %19 = arith.addf %17, %18 : vector<2x2x2x128xf32>
    %20 = vector.extract_strided_slice %14 {offsets = [0, 3, 0, 0], sizes = [2, 2, 2, 128], strides = [1, 1, 1, 1]} : vector<2x8x2x128xf32> to vector<2x2x2x128xf32>
    %21 = arith.addf %19, %20 : vector<2x2x2x128xf32>
    %22 = vector.extract_strided_slice %14 {offsets = [0, 4, 0, 0], sizes = [2, 2, 2, 128], strides = [1, 1, 1, 1]} : vector<2x8x2x128xf32> to vector<2x2x2x128xf32>
    %23 = arith.addf %21, %22 : vector<2x2x2x128xf32>
    %24 = vector.extract_strided_slice %14 {offsets = [0, 5, 0, 0], sizes = [2, 2, 2, 128], strides = [1, 1, 1, 1]} : vector<2x8x2x128xf32> to vector<2x2x2x128xf32>
    %25 = arith.addf %23, %24 : vector<2x2x2x128xf32>
    %26 = vector.extract_strided_slice %14 {offsets = [0, 6, 0, 0], sizes = [2, 2, 2, 128], strides = [1, 1, 1, 1]} : vector<2x8x2x128xf32> to vector<2x2x2x128xf32>
    %27 = arith.addf %25, %26 : vector<2x2x2x128xf32>
    %28 = vector.shape_cast %27 : vector<2x2x2x128xf32> to vector<8x128xf32>
    %29 = arith.truncf %28 : vector<8x128xf32> to vector<8x128xbf16>
    %c0_3 = arith.constant 0 : index
    %c0_4 = arith.constant 0 : index
    %30 = vector.load %arg2[%c0_3, %c0_4] : memref<128x128xbf16, #tpu.memory_space<vmem>>, vector<128x128xbf16>
    %cst = arith.constant dense<0.000000e+00> : vector<8x128xf32>
    %31 = tpu.matmul %29, %30, %cst {dimension_numbers = #tpu.dot_dimension_numbers<[1], [0], [0], [1], [0, 0, 1, 1], [], []>} : vector<8x128xbf16>, vector<128x128xbf16>, vector<8x128xf32> -> vector<8x128xf32>
    %c0_5 = arith.constant 0 : index
    %c0_6 = arith.constant 0 : index
    %32 = vector.load %arg3[%c0_5, %c0_6] : memref<1x128xf32, #tpu.memory_space<vmem>>, vector<1x128xf32>
    %33 = vector.broadcast %32 : vector<1x128xf32> to vector<8x128xf32>
    %34 = arith.addf %31, %33 : vector<8x128xf32>
    %35 = vector.shape_cast %34 : vector<8x128xf32> to vector<2x4x128xf32>
    %c0_7 = arith.constant 0 : index
    %c0_8 = arith.constant 0 : index
    %c0_9 = arith.constant 0 : index
    %36 = vector.load %arg4[%c0_7, %c0_8, %c0_9] : memref<2x4x128xf32, #tpu.memory_space<vmem>>, vector<2x4x128xf32>
    tpu.vector_store %arg4[%c0_7, %c0_8, %c0_9], %35 {strides = array<i32>} : memref<2x4x128xf32, #tpu.memory_space<vmem>>, vector<2x4x128xf32>,
    return
  }
  func.func @transform_0(%arg0: i32) -> (i32, i32, i32, i32) {
    %c0_i32 = arith.constant 0 : i32
    %c0_i32_0 = arith.constant 0 : i32
    %c0_i32_1 = arith.constant 0 : i32
    %c0_i32_2 = arith.constant 0 : i32
    return %arg0, %c0_i32, %c0_i32_0, %c0_i32_1 : i32, i32, i32, i32
  }
  func.func @transform_1(%arg0: i32) -> (i32, i32) {
    %c0_i32 = arith.constant 0 : i32
    %c0_i32_0 = arith.constant 0 : i32
    %c0_i32_1 = arith.constant 0 : i32
    return %c0_i32, %c0_i32_0 : i32, i32
  }
  func.func @transform_2(%arg0: i32) -> (i32, i32) {
    %c0_i32 = arith.constant 0 : i32
    %c0_i32_0 = arith.constant 0 : i32
    %c0_i32_1 = arith.constant 0 : i32
    return %c0_i32, %c0_i32_0 : i32, i32
  }
  func.func @transform_3(%arg0: i32) -> (i32, i32, i32) {
    %c0_i32 = arith.constant 0 : i32
    %c0_i32_0 = arith.constant 0 : i32
    %c0_i32_1 = arith.constant 0 : i32
    return %arg0, %c0_i32, %c0_i32_0 : i32, i32, i32
  }
}

</mosaic_0001>

<bundles_post_ra>
// kernel: visual_feature_extractor_forward.2
= control target key start
LH: loop header
LB: loop body
LE: loop exit
PB: predicated region body
PF: predicated region fallthrough
CT: control target
= control target key end

     0   :  { %s823_s0 = inlined_call_operand.vmem [shape: bf16[2,8,8,128], index: 0, kind: input, shape index: {}]   ;;  %s824_s1 = inlined_call_operand.vmem [shape: bf16[128,128], index: 1, kind: input, shape index: {}]   ;;  %s825_s2 = inlined_call_operand.vmem [shape: f32[1,128], index: 2, kind: input, shape index: {}]   ;;  %s826_s3 = inlined_call_operand.hbm [shape: f32[2,4,128], index: 3, kind: output, shape index: {}]  }
   0x1   :  { %v532_v0 = vld [vmem:[%s824_s1 + $0x38] sm:$0xff]  ;;  %v531_v1 = vld [vmem:[%s824_s1 + $0x30] sm:$0xff]  ;;  %v534_v2 = vld [vmem:[%s823_s0] sm:$0xff]  }
   0x2   :  { %457 = vmatpush.bf16.msra.mxu0 %v532_v0  ;;  %v565_v3 = vld [vmem:[%s823_s0 + $0x8] sm:$0xff]   ;;  %v566_v4 = vld [vmem:[%s823_s0 + $0x10] sm:$0xff]   ;;  %v567_v5 = vld [vmem:[%s823_s0 + $0x18] sm:$0xff]  }
   0x3   :  { %v568_v6 = vld [vmem:[%s823_s0 + $0x20] sm:$0xff]   ;;  %v569_v7 = vld [vmem:[%s823_s0 + $0x28] sm:$0xff]  }
   0x4   :  { %8 = vsyncpa [#allocation3], 0  ;;  %v530_v8 = vld [vmem:[%s824_s1 + $0x28] sm:$0xff]  ;;  %v652_v9 = vunpack.c.l.bf16 %v534_v2  ;;  %v654_v10 = vunpack.c.h.bf16 %v534_v2  ;;  %v656_v11 = vunpack.c.l.bf16 %v565_v3  ;;  %v658_v12 = vunpack.c.h.bf16 %v565_v3  ;;  %v570_v13 = vld [vmem:[%s823_s0 + $0x30] sm:$0xff]   ;;  %s602_s17 = smov [#allocation2]   ;;  %s481_s21 = sshll.u32 %s826_s3, 4  ;;  %s482_s21 = int_to_ptr.hbm [resolvable:$true] %s481_s21 }
   0x5   :  { %v571_v14 = vld [vmem:[%s823_s0 + $0x38] sm:$0xff]   ;;  %v666_v15 = vunpack.c.l.bf16 %v566_v4  ;;  %v668_v16 = vunpack.c.h.bf16 %v566_v4  ;;  %v670_v17 = vunpack.c.l.bf16 %v567_v5  ;;  %v672_v18 = vunpack.c.h.bf16 %v567_v5  ;;  %v529_v27 = vld [vmem:[%s824_s1 + $0x20] sm:$0xff]  ;;  %v527_v61 = vld [vmem:[%s824_s1 + $0x10] sm:$0xff]  ;;  %s479_s18 = sshll.u32 %s602_s17, 4  ;;  %s603_s22 = smov 64   ;;  %s480_s18 = int_to_ptr.vmem [resolvable:$true] %s479_s18 }
   0x6   :  { %458 = vmatpush.bf16.msra.mxu0 %v531_v1  ;;  %v674_v19 = vunpack.c.l.bf16 %v568_v6  ;;  %v676_v20 = vunpack.c.h.bf16 %v568_v6  ;;  %v678_v21 = vunpack.c.l.bf16 %v569_v7  ;;  %v680_v22 = vunpack.c.h.bf16 %v569_v7  ;;  %v528_v44 = vld [vmem:[%s824_s1 + $0x18] sm:$0xff]  ;;  %s604_s23 = smov 4  }
   0x7   :  { %v682_v23 = vunpack.c.l.bf16 %v570_v13  ;;  %v684_v24 = vunpack.c.h.bf16 %v570_v13  ;;  %v686_v25 = vunpack.c.l.bf16 %v571_v14  ;;  %v688_v26 = vunpack.c.h.bf16 %v571_v14 }
   0x8   :  { %v63_v28 = vrot.slane %v652_v9, 1  ;;  %v64_v29 = vrot.slane %v654_v10, 1  ;;  %v65_v30 = vrot.slane %v656_v11, 1  ;;  %v66_v31 = vrot.slane %v658_v12, 1 }
   0x9   :  { %834 = vst [vmem:[#allocation5_spill] sm:$0xff] %v684_v24  ;;  %v67_v32 = vrot.slane %v666_v15, 1  ;;  %v68_v33 = vrot.slane %v668_v16, 1  ;;  %v69_v34 = vrot.slane %v670_v17, 1  ;;  %v70_v35 = vrot.slane %v672_v18, 1 }
   0xa   :  { %835 = vst [vmem:[#allocation6_spill] sm:$0xff] %v686_v25  ;;  %459 = vmatpush.bf16.msra.mxu0 %v530_v8  ;;  %v71_v36 = vrot.slane %v674_v19, 1  ;;  %v72_v37 = vrot.slane %v676_v20, 1  ;;  %v73_v38 = vrot.slane %v678_v21, 1  ;;  %v74_v39 = vrot.slane %v680_v22, 1 }
   0xb   :  { %836 = vst [vmem:[#allocation7_spill] sm:$0xff] %v688_v26  ;;  %v75_v40 = vrot.slane %v682_v23, 1  ;;  %v76_v41 = vrot.slane %v684_v24, 1  ;;  %v77_v42 = vrot.slane %v686_v25, 1  ;;  %v78_v43 = vrot.slane %v688_v26, 1 }
   0xc   :  { %v95_v45 = vadd.f32 %v652_v9, %v63_v28  ;;  %v96_v46 = vadd.f32 %v654_v10, %v64_v29  ;;  %v97_v47 = vadd.f32 %v656_v11, %v65_v30  ;;  %v98_v48 = vadd.f32 %v658_v12, %v66_v31  ;;  %v526_v30 = vld [vmem:[%s824_s1 + $0x8] sm:$0xff] }
   0xd   :  { %v99_v49 = vadd.f32 %v666_v15, %v67_v32  ;;  %v100_v50 = vadd.f32 %v668_v16, %v68_v33  ;;  %v101_v51 = vadd.f32 %v670_v17, %v69_v34  ;;  %v102_v52 = vadd.f32 %v672_v18, %v70_v35 }
   0xe   :  { %460 = vmatpush.bf16.msra.mxu0 %v529_v27  ;;  %v103_v53 = vadd.f32 %v674_v19, %v71_v36  ;;  %v104_v54 = vadd.f32 %v676_v20, %v72_v37  ;;  %v105_v55 = vadd.f32 %v678_v21, %v73_v38  ;;  %v106_v56 = vadd.f32 %v680_v22, %v74_v39 }
   0xf   :  { %v107_v57 = vadd.f32 %v682_v23, %v75_v40  ;;  %v108_v58 = vadd.f32 %v684_v24, %v76_v41  ;;  %v109_v59 = vadd.f32 %v686_v25, %v77_v42  ;;  %v110_v60 = vadd.f32 %v688_v26, %v78_v43 }
  0x10   :  { %v111_v62 = vrot.slane %v652_v9, 2  ;;  %v112_v63 = vrot.slane %v654_v10, 2  ;;  %v113_v0 = vrot.slane %v656_v11, 2  ;;  %v114_v1 = vrot.slane %v658_v12, 2 }
  0x11   :  { %v115_v2 = vrot.slane %v666_v15, 2  ;;  %v116_v3 = vrot.slane %v668_v16, 2  ;;  %v117_v4 = vrot.slane %v670_v17, 2  ;;  %v118_v5 = vrot.slane %v672_v18, 2 }
  0x12   :  { %461 = vmatpush.bf16.msra.mxu0 %v528_v44  ;;  %v119_v6 = vrot.slane %v674_v19, 2  ;;  %v120_v7 = vrot.slane %v676_v20, 2  ;;  %v121_v8 = vrot.slane %v678_v21, 2  ;;  %v122_v13 = vrot.slane %v680_v22, 2 }
  0x13   :  { %v123_v14 = vrot.slane %v682_v23, 2  ;;  %v124_v27 = vrot.slane %v684_v24, 2  ;;  %v125_v28 = vrot.slane %v686_v25, 2  ;;  %v126_v29 = vrot.slane %v688_v26, 2 }
  0x14   :  { %v143_v31 = vadd.f32 %v111_v62, %v95_v45  ;;  %v144_v32 = vadd.f32 %v112_v63, %v96_v46  ;;  %v145_v33 = vadd.f32 %v113_v0, %v97_v47  ;;  %v146_v34 = vadd.f32 %v114_v1, %v98_v48  ;;  %v525_v45 = vld [vmem:[%s824_s1] sm:$0xff] }
  0x15   :  { %v147_v35 = vadd.f32 %v115_v2, %v99_v49  ;;  %v148_v36 = vadd.f32 %v116_v3, %v100_v50  ;;  %v149_v37 = vadd.f32 %v117_v4, %v101_v51  ;;  %v150_v38 = vadd.f32 %v118_v5, %v102_v52  ;;  %v837_v62 = vld [vmem:[#allocation7_spill] sm:$0xff] }
  0x16   :  { %462 = vmatpush.bf16.msra.mxu0 %v527_v61  ;;  %v151_v39 = vadd.f32 %v119_v6, %v103_v53  ;;  %v152_v40 = vadd.f32 %v120_v7, %v104_v54  ;;  %v153_v41 = vadd.f32 %v121_v8, %v105_v55  ;;  %v154_v42 = vadd.f32 %v122_v13, %v106_v56 }
  0x17   :  { %v155_v43 = vadd.f32 %v123_v14, %v107_v57  ;;  %v156_v44 = vadd.f32 %v124_v27, %v108_v58  ;;  %v157_v26 = vadd.f32 %v125_v28, %v109_v59  ;;  %v158_v61 = vadd.f32 %v126_v29, %v110_v60 }
  0x18   :  { %v159_v46 = vrot.slane %v652_v9, 3  ;;  %v160_v47 = vrot.slane %v654_v10, 3  ;;  %v161_v48 = vrot.slane %v656_v11, 3  ;;  %v162_v49 = vrot.slane %v658_v12, 3 }
  0x19   :  { %v163_v50 = vrot.slane %v666_v15, 3  ;;  %v164_v51 = vrot.slane %v668_v16, 3  ;;  %v165_v52 = vrot.slane %v670_v17, 3  ;;  %v166_v53 = vrot.slane %v672_v18, 3 }
  0x1a   :  { %463 = vmatpush.bf16.msra.mxu0 %v526_v30  ;;  %v167_v54 = vrot.slane %v674_v19, 3  ;;  %v168_v55 = vrot.slane %v676_v20, 3  ;;  %v169_v56 = vrot.slane %v678_v21, 3  ;;  %v170_v57 = vrot.slane %v680_v22, 3 }
  0x1b   :  { %v171_v58 = vrot.slane %v682_v23, 3  ;;  %v172_v59 = vrot.slane %v684_v24, 3  ;;  %v173_v60 = vrot.slane %v686_v25, 3  ;;  %v174_v63 = vrot.slane %v837_v62, 3 }
  0x1c   :  { %v191_v0 = vadd.f32 %v159_v46, %v143_v31  ;;  %v192_v1 = vadd.f32 %v160_v47, %v144_v32  ;;  %v193_v2 = vadd.f32 %v161_v48, %v145_v33  ;;  %v194_v3 = vadd.f32 %v162_v49, %v146_v34 }
  0x1d   :  { %v195_v4 = vadd.f32 %v163_v50, %v147_v35  ;;  %v196_v5 = vadd.f32 %v164_v51, %v148_v36  ;;  %v197_v6 = vadd.f32 %v165_v52, %v149_v37  ;;  %v198_v7 = vadd.f32 %v166_v53, %v150_v38 }
  0x1e   :  { %464 = vmatpush.bf16.msra.mxu0 %v525_v45  ;;  %v199_v8 = vadd.f32 %v167_v54, %v151_v39  ;;  %v200_v13 = vadd.f32 %v168_v55, %v152_v40  ;;  %v201_v14 = vadd.f32 %v169_v56, %v153_v41  ;;  %v202_v27 = vadd.f32 %v170_v57, %v154_v42  ;;  %v838_v41 = vld [vmem:[#allocation5_spill] sm:$0xff] }
  0x1f   :  { %v203_v28 = vadd.f32 %v171_v58, %v155_v43  ;;  %v204_v29 = vadd.f32 %v172_v59, %v156_v44  ;;  %v205_v30 = vadd.f32 %v173_v60, %v157_v26  ;;  %v206_v24 = vadd.f32 %v174_v63, %v158_v61  ;;  %v839_v43 = vld [vmem:[#allocation6_spill] sm:$0xff] }
  0x20   :  { %v207_v25 = vrot.slane %v652_v9, 4  ;;  %v208_v45 = vrot.slane %v654_v10, 4  ;;  %v209_v31 = vrot.slane %v656_v11, 4  ;;  %v210_v32 = vrot.slane %v658_v12, 4 }
  0x21   :  { %v211_v33 = vrot.slane %v666_v15, 4  ;;  %v212_v34 = vrot.slane %v668_v16, 4  ;;  %v213_v35 = vrot.slane %v670_v17, 4  ;;  %v214_v36 = vrot.slane %v672_v18, 4 }
  0x22   :  { %v215_v37 = vrot.slane %v674_v19, 4  ;;  %v216_v26 = vrot.slane %v676_v20, 4  ;;  %v217_v38 = vrot.slane %v678_v21, 4  ;;  %v218_v39 = vrot.slane %v680_v22, 4 }
  0x23   :  { %v219_v40 = vrot.slane %v682_v23, 4  ;;  %v220_v42 = vrot.slane %v838_v41, 4  ;;  %v221_v44 = vrot.slane %v839_v43, 4  ;;  %v222_v61 = vrot.slane %v837_v62, 4 }
  0x24   :  { %v239_v46 = vadd.f32 %v207_v25, %v191_v0  ;;  %v240_v47 = vadd.f32 %v208_v45, %v192_v1  ;;  %v241_v48 = vadd.f32 %v209_v31, %v193_v2  ;;  %v242_v49 = vadd.f32 %v210_v32, %v194_v3 }
  0x25   :  { %v243_v50 = vadd.f32 %v211_v33, %v195_v4  ;;  %v244_v51 = vadd.f32 %v212_v34, %v196_v5  ;;  %v245_v52 = vadd.f32 %v213_v35, %v197_v6  ;;  %v246_v53 = vadd.f32 %v214_v36, %v198_v7 }
  0x26   :  { %v247_v54 = vadd.f32 %v215_v37, %v199_v8  ;;  %v248_v55 = vadd.f32 %v216_v26, %v200_v13  ;;  %v249_v56 = vadd.f32 %v217_v38, %v201_v14  ;;  %v250_v57 = vadd.f32 %v218_v39, %v202_v27  ;;  %v840_v14 = vld [vmem:[#allocation6_spill] sm:$0xff] }
  0x27   :  { %v251_v58 = vadd.f32 %v219_v40, %v203_v28  ;;  %v252_v59 = vadd.f32 %v220_v42, %v204_v29  ;;  %v253_v60 = vadd.f32 %v221_v44, %v205_v30  ;;  %v254_v63 = vadd.f32 %v222_v61, %v206_v24  ;;  %v841_v28 = vld [vmem:[#allocation7_spill] sm:$0xff] }
  0x28   :  { %v255_v43 = vrot.slane %v652_v9, 5  ;;  %v256_v62 = vrot.slane %v654_v10, 5  ;;  %v257_v25 = vrot.slane %v656_v11, 5  ;;  %v258_v0 = vrot.slane %v658_v12, 5 }
  0x29   :  { %v259_v1 = vrot.slane %v666_v15, 5  ;;  %v260_v2 = vrot.slane %v668_v16, 5  ;;  %v261_v3 = vrot.slane %v670_v17, 5  ;;  %v262_v4 = vrot.slane %v672_v18, 5 }
  0x2a   :  { %v263_v5 = vrot.slane %v674_v19, 5  ;;  %v264_v24 = vrot.slane %v676_v20, 5  ;;  %v265_v6 = vrot.slane %v678_v21, 5  ;;  %v266_v7 = vrot.slane %v680_v22, 5 }
  0x2b   :  { %v267_v8 = vrot.slane %v682_v23, 5  ;;  %v268_v13 = vrot.slane %v838_v41, 5  ;;  %v269_v27 = vrot.slane %v840_v14, 5  ;;  %v270_v29 = vrot.slane %v841_v28, 5 }
  0x2c   :  { %v287_v30 = vadd.f32 %v255_v43, %v239_v46  ;;  %v288_v45 = vadd.f32 %v256_v62, %v240_v47  ;;  %v289_v31 = vadd.f32 %v257_v25, %v241_v48  ;;  %v290_v32 = vadd.f32 %v258_v0, %v242_v49 }
  0x2d   :  { %v291_v33 = vadd.f32 %v259_v1, %v243_v50  ;;  %v292_v34 = vadd.f32 %v260_v2, %v244_v51  ;;  %v303_v35 = vrot.slane %v652_v9, 6  ;;  %v304_v36 = vrot.slane %v654_v10, 6 }
  0x2e   :  { %v293_v37 = vadd.f32 %v261_v3, %v245_v52  ;;  %v294_v26 = vadd.f32 %v262_v4, %v246_v53  ;;  %v295_v38 = vadd.f32 %v263_v5, %v247_v54  ;;  %v305_v39 = vrot.slane %v656_v11, 6 }
  0x2f   :  { %v296_v40 = vadd.f32 %v264_v24, %v248_v55  ;;  %v306_v42 = vrot.slane %v658_v12, 6  ;;  %v311_v44 = vrot.slane %v674_v19, 6  ;;  %v312_v62 = vrot.slane %v676_v20, 6 }
  0x30   :  { %v297_v43 = vadd.f32 %v265_v6, %v249_v56  ;;  %v298_v61 = vadd.f32 %v266_v7, %v250_v57  ;;  %v313_v46 = vrot.slane %v678_v21, 6  ;;  %v314_v9 = vrot.slane %v680_v22, 6 }
  0x31   :  { %v299_v47 = vadd.f32 %v267_v8, %v251_v58  ;;  %v307_v10 = vrot.slane %v666_v15, 6  ;;  %v335_v48 = vadd.f32 %v303_v35, %v287_v30  ;;  %v336_v49 = vadd.f32 %v304_v36, %v288_v45 }
  0x32   :  { %v300_v50 = vadd.f32 %v268_v13, %v252_v59  ;;  %v301_v11 = vadd.f32 %v269_v27, %v253_v60  ;;  %v315_v51 = vrot.slane %v682_v23, 6  ;;  %v337_v12 = vadd.f32 %v305_v39, %v289_v31 }
  0x33   :  { %v308_v19 = vrot.slane %v668_v16, 6  ;;  %v338_v52 = vadd.f32 %v306_v42, %v290_v32  ;;  %v343_v20 = vadd.f32 %v311_v44, %v295_v38  ;;  %v344_v53 = vadd.f32 %v312_v62, %v296_v40 }
  0x34   :  { %v302_v54 = vadd.f32 %v270_v29, %v254_v63  ;;  %v316_v21 = vrot.slane %v838_v41, 6  ;;  %v345_v55 = vadd.f32 %v313_v46, %v297_v43  ;;  %v346_v22 = vadd.f32 %v314_v9, %v298_v61 }
  0x35   :  { %v309_v56 = vrot.slane %v670_v17, 6  ;;  %v339_v15 = vadd.f32 %v307_v10, %v291_v33  ;;  %v351_v57 = vadd.f32 %v336_v49, %v335_v48  ;;  %v352_v58 = vadd.f32 %v337_v12, %v336_v49 }
  0x36   :  { %v317_v59 = vrot.slane %v840_v14, 6  ;;  %v347_v60 = vadd.f32 %v315_v51, %v299_v47  ;;  %v353_v23 = vadd.f32 %v344_v53, %v343_v20  ;;  %v354_v25 = vadd.f32 %v345_v55, %v344_v53 }
  0x37   :  { %v310_v16 = vrot.slane %v672_v18, 6  ;;  %v340_v0 = vadd.f32 %v308_v19, %v292_v34  ;;  %v355_v1 = vadd.f32 %v351_v57, %v337_v12  ;;  %v356_v2 = vadd.f32 %v352_v58, %v338_v52 }
  0x38   :  { %v318_v63 = vrot.slane %v841_v28, 6  ;;  %v348_v41 = vadd.f32 %v316_v21, %v300_v50  ;;  %v357_v3 = vadd.f32 %v353_v23, %v345_v55  ;;  %v358_v4 = vadd.f32 %v354_v25, %v346_v22 }
  0x39   :  { %v341_v5 = vadd.f32 %v309_v56, %v293_v37  ;;  %v359_v17 = vadd.f32 %v355_v1, %v338_v52  ;;  %v360_v24 = vadd.f32 %v356_v2, %v339_v15  ;;  %v349_v6 = vadd.f32 %v317_v59, %v301_v11 }
  0x3a   :  { %v361_v7 = vadd.f32 %v357_v3, %v346_v22  ;;  %v362_v8 = vadd.f32 %v358_v4, %v347_v60  ;;  %v342_v13 = vadd.f32 %v310_v16, %v294_v26  ;;  %v350_v29 = vadd.f32 %v318_v63, %v302_v54  ;;  %v575_v26 = vld [vmem:[%s825_s2] ss:$0 sm:$0xff] }
  0x3b   :  { %v363_v14 = vadd.f32 %v359_v17, %v339_v15  ;;  %v364_v27 = vadd.f32 %v360_v24, %v340_v0 }
  0x3c   :  { %v365_v30 = vadd.f32 %v361_v7, %v347_v60  ;;  %v366_v18 = vadd.f32 %v362_v8, %v348_v41 }
  0x3d   :  { %v367_v45 = vadd.f32 %v363_v14, %v340_v0  ;;  %v368_v31 = vadd.f32 %v364_v27, %v341_v5 }
  0x3e   :  { %v369_v32 = vadd.f32 %v365_v30, %v348_v41  ;;  %v370_v33 = vadd.f32 %v366_v18, %v349_v6 }
  0x3f   :  { %v371_v28 = vadd.f32 %v367_v45, %v341_v5  ;;  %v372_v34 = vadd.f32 %v368_v31, %v342_v13 }
  0x40   :  { %v373_v35 = vadd.f32 %v369_v32, %v349_v6  ;;  %v374_v36 = vadd.f32 %v370_v33, %v350_v29 }
  0x41   :  { %379 = vst [vmem:[#allocation1] ss:$4 sm:$0xff] %v371_v28 }
  0x42   :  { %381 = vst [vmem:[#allocation1 + $0x1] ss:$4 sm:$0xff] %v372_v34 }
  0x43   :  { %383 = vst [vmem:[#allocation1 + $0x2] ss:$4 sm:$0xff] %v373_v35 }
  0x44   :  { %385 = vst [vmem:[#allocation1 + $0x3] ss:$4 sm:$0xff] %v374_v36 }
  0x4b   :  { %v386_v37 = vld.sshfl [vmem:[#allocation1] sm:$0xff pattern:$0x73625140] }
  0x4c   :  { %v388_v38 = vpack.c.bf16 %v386_v37, %v386_v37 }
  0x4e   :  { %465 = vmatmul.bf16.vlgmr.msra.gmra.mxu0 %v388_v38 }
  0xcb   :  { %v466_v39 = vpop.f32.mrf.mxu0 }
  0xcc   :  { %v467_v40 = vadd.f32 %v575_v26, %v466_v39 }
  0xce   :  { %v471_v42 = vrot.slane %v467_v40, 4  ;;  %473 = vst [vmem:[#allocation2] sm:$0xf] %v467_v40 }
  0xd0   :  { %474 = vst [vmem:[#allocation2 + $0x4] sm:$0xf] %v471_v42 }
  0xd1   :  { %487 = dma.vmem_to_hbm [thread:$0]  %s480_s18, 128, %s482_s21, [#allocation3], %s603_s22, %s603_s22, %s604_s23  }
  0xd3   :  { %v468_v44 = vpop.f32.mrf.mxu0 }
  0xd4   :  { %600 = dma.done.wait [#allocation3], 128  }
  0xd5   :  { %601 = vsyncadd [#allocation3], 4294967168 }
  0xd6   :  { %492 = vsyncpa [#allocation3], 1 }

</bundles_post_ra>
